<compile_context>
chip_gen: v5e
topology: v5e:2x2
jax: 0.10.0
libtpu: 0.0.40
codegen_flags: <defaults>
</compile_context>

<pallas_src>
import math

import jax
import jax.numpy as jnp
from jax import lax
from jax.experimental import pallas as pl
from jax.experimental.pallas import tpu as pltpu

LANES = 128
ACC_ROWS = 8  # one f32 sublane tile; accumulator is (ACC_ROWS, cols)


def _cdiv(a: int, b: int) -> int:
    return -(-a // b)


def _round_up(x: int, m: int) -> int:
    return ((x + m - 1) // m) * m


def _num_tensorcores() -> int:
    """Best-effort TensorCores-per-device (2 only on v7x-class chips)."""
    try:
        kind = jax.devices()[0].device_kind.lower()
    except Exception:
        return 1
    if "v7" in kind or "7x" in kind:
        return 2
    return 1


def _make_kernel(steps, block_rows, rows, cols, full_blocks, needs_mask, acc_rows):
    def kernel(p_ref, a_ref, out_ref, acc_ref):
        c = pl.program_id(0)
        i = pl.program_id(1)

        @pl.when(i == 0)
        def _():
            acc_ref[...] = jnp.zeros_like(acc_ref)

        def accumulate(masked):
            p = p_ref[...].astype(jnp.float32)
            a = a_ref[...].astype(jnp.float32)
            if masked:
                row0 = (c * steps + i) * block_rows
                rid = lax.broadcasted_iota(jnp.int32, (block_rows, cols), 0) + row0
                valid = rid < rows
                # Mask BEFORE any arithmetic / log1p so garbage (possibly NaN/Inf)
                # in out-of-bounds rows never propagates into the sum.
                p = jnp.where(valid, p, 0.0)
                a = jnp.where(valid, a, 0.0)
            d = jnp.log1p(jnp.maximum(p, 0.0)) - jnp.log1p(jnp.maximum(a, 0.0))
            sq = d * d
            # Fold into a small accumulator: leading-axis reduce = VPU adds only.
            acc_ref[...] += sq.reshape(block_rows // acc_rows, acc_rows, cols).sum(axis=0)

        if needs_mask:
            blk = c * steps + i

            @pl.when(blk < full_blocks)
            def _():
                accumulate(False)

            @pl.when(blk >= full_blocks)
            def _():
                accumulate(True)
        else:
            accumulate(False)

        @pl.when(i == pl.num_programs(1) - 1)
        def _():
            out_ref[0, 0] = jnp.sum(acc_ref[...])

    return kernel


def msle_loss(pred: jax.Array, actual: jax.Array, *,
              max_block_rows: int = 1024,
              vmem_block_budget: int = 8 * 1024 * 1024) -> jax.Array:
    """Mean squared log error computed with a Pallas TPU kernel."""
    assert pred.shape == actual.shape, "pred/actual must have identical shapes"
    n = math.prod(pred.shape)
    assert n > 0, "inputs must be non-empty"

    # Copy-free 2-D presentation (no jnp.pad of the full inputs).
    if n % LANES == 0:
        rows, cols = n // LANES, LANES                    # lane-dense
    else:
        cols = pred.shape[-1] if pred.ndim >= 2 else n    # natural last dim
        rows = n // cols
    p2 = pred.reshape(rows, cols)
    a2 = actual.reshape(rows, cols)

    # Sublane multiple for the narrowest input dtype (f32->8, bf16->16, int8->32).
    min_itemsize = min(jnp.dtype(pred.dtype).itemsize, jnp.dtype(actual.dtype).itemsize)
    sub = 8 * max(1, 4 // min_itemsize)

    shards = _num_tensorcores()
    if rows < shards * sub:
        shards = 1

    # Block-row cap: requested max, VMEM budget (2 inputs x 2 pipeline buffers),
    # rounded down to the sublane multiple.
    cols_pad = _round_up(cols, LANES)
    per_row_bytes = 2 * cols_pad * (jnp.dtype(pred.dtype).itemsize
                                    + jnp.dtype(actual.dtype).itemsize)
    cap = min(int(max_block_rows), max(1, vmem_block_budget // per_row_bytes))
    cap = max(sub, (cap // sub) * sub)

    # Steps first, then rebalance block_rows: dead work <= one partial block.
    rows_per_shard = _cdiv(rows, shards)
    steps = _cdiv(rows_per_shard, cap)
    block_rows = _round_up(_cdiv(rows_per_shard, steps), sub)
    if shards * steps == 1:
        block_rows = rows  # single full-array block: no masking, no padding
    acc_rows = ACC_ROWS if block_rows % ACC_ROWS == 0 else block_rows

    total_blocks = shards * steps
    full_blocks = rows // block_rows
    needs_mask = total_blocks * block_rows != rows
    last_blk = _cdiv(rows, block_rows) - 1  # clamp target for all-OOB grid points

    def in_map(c, i):
        return (jnp.minimum(c * steps + i, last_blk), 0)

    kernel = _make_kernel(steps, block_rows, rows, cols, full_blocks, needs_mask, acc_rows)

    dim_sem = ((pltpu.CORE_PARALLEL, pltpu.ARBITRARY) if shards > 1
               else ("arbitrary", "arbitrary"))

    partial = pl.pallas_call(
        kernel,
        out_shape=jax.ShapeDtypeStruct((shards, 1), jnp.float32),
        grid_spec=pltpu.PrefetchScalarGridSpec(
            num_scalar_prefetch=0,
            grid=(shards, steps),
            in_specs=[
                pl.BlockSpec((block_rows, cols), in_map),
                pl.BlockSpec((block_rows, cols), in_map),
            ],
            out_specs=pl.BlockSpec((1, 1), lambda c, i: (c, 0),
                                   memory_space=pltpu.SMEM),
            scratch_shapes=[pltpu.VMEM((acc_rows, cols), jnp.float32)],
        ),
        compiler_params=pltpu.CompilerParams(dimension_semantics=dim_sem),
    )(p2, a2)

    return (jnp.sum(partial) / jnp.float32(n)).astype(jnp.float32)


def _msle_ref(pred, actual):
    """Pure-JAX reference for correctness checking."""
    p = jnp.log1p(jnp.maximum(pred.astype(jnp.float32), 0.0))
    a = jnp.log1p(jnp.maximum(actual.astype(jnp.float32), 0.0))
    return jnp.mean((p - a) ** 2)


if __name__ == "__main__":
    key = jax.random.PRNGKey(0)
    ks = jax.random.split(key, 8)

    # 1) Deconvolution-like, lane-aligned: 32 spots x 128 genes (single block).
    p1 = jax.random.normal(ks[0], (32, 128), dtype=jnp.float32) * 2.0
    a1 = jax.random.normal(ks[1], (32, 128), dtype=jnp.float32) * 2.0
    l1 = jax.block_until_ready(msle_loss(p1, a1))
    r1 = _msle_ref(p1, a1)
    assert jnp.allclose(l1, r1, rtol=1e-5, atol=1e-6), (l1, r1)

    # 2) Odd tiny shape (no pad copy, single full-array block): 7 spots x 53 genes.
    p2 = jax.random.normal(ks[2], (7, 53), dtype=jnp.float32) * 2.0
    a2 = jax.random.normal(ks[3], (7, 53), dtype=jnp.float32) * 2.0
    l2 = jax.block_until_ready(msle_loss(p2, a2))
    r2 = _msle_ref(p2, a2)
    assert jnp.allclose(l2, r2, rtol=1e-5, atol=1e-6), (l2, r2)

    # 3) Multi-step grid with an in-kernel masked ragged tail (small tile forces it).
    p3 = jax.random.normal(ks[4], (60, 256), dtype=jnp.float32) * 2.0
    a3 = jax.random.normal(ks[5], (60, 256), dtype=jnp.float32) * 2.0
    l3 = jax.block_until_ready(msle_loss(p3, a3, max_block_rows=16))
    r3 = _msle_ref(p3, a3)
    assert jnp.allclose(l3, r3, rtol=1e-5, atol=1e-6), (l3, r3)

    # 4) Native bf16 inputs, non-lane-aligned, multi-step masked tail.
    p4 = (jax.random.normal(ks[6], (25, 53), dtype=jnp.float32) * 2.0).astype(jnp.bfloat16)
    a4 = (jax.random.normal(ks[7], (25, 53), dtype=jnp.float32) * 2.0).astype(jnp.bfloat16)
    l4 = jax.block_until_ready(msle_loss(p4, a4, max_block_rows=16))
    r4 = _msle_ref(p4, a4)
    assert jnp.allclose(l4, r4, rtol=1e-5, atol=1e-6), (l4, r4)

    print("KERNEL_OK")
</pallas_src>

<mosaic_0001>
module attributes {stable_mosaic.version = 11 : i64} {
  func.func @kernel(%arg0: i32, %arg1: i32, %arg2: memref<32x128xf32, #tpu.memory_space<vmem>>, %arg3: memref<32x128xf32, #tpu.memory_space<vmem>>, %arg4: memref<1x1xf32, #tpu.memory_space<smem>>, %arg5: memref<8x128xf32, #tpu.memory_space<vmem>>) attributes {dimension_semantics = [#tpu.dimension_semantics<arbitrary>, #tpu.dimension_semantics<arbitrary>], iteration_bounds = array<i64: 1, 1>, scalar_prefetch = 0 : i64, scratch_operands = 1 : i64, tpu.core_type = #tpu.core_type<tc>, window_params = [{transform_indices = @transform_0, window_bounds = array<i64: 32, 128>}, {transform_indices = @transform_1, window_bounds = array<i64: 32, 128>}, {transform_indices = @transform_2, window_bounds = array<i64: 1, 1>}]} {
    %c0_i32 = arith.constant 0 : i32
    %0 = arith.cmpi eq, %arg1, %c0_i32 : i32
    %1 = arith.extui %0 : i1 to i32
    %c0_i32_0 = arith.constant 0 : i32
    %2 = arith.cmpi ne, %1, %c0_i32_0 : i32
    scf.if %2 {
      %cst_12 = arith.constant 0.000000e+00 : f32
      %21 = vector.broadcast %cst_12 : f32 to vector<8x128xf32>
      %c0_13 = arith.constant 0 : index
      %c0_14 = arith.constant 0 : index
      %22 = vector.load %arg5[%c0_13, %c0_14] : memref<8x128xf32, #tpu.memory_space<vmem>>, vector<8x128xf32>
      tpu.vector_store %arg5[%c0_13, %c0_14], %21 {strides = array<i32>} : memref<8x128xf32, #tpu.memory_space<vmem>>, vector<8x128xf32>,
    } else {
    }
    %c0 = arith.constant 0 : index
    %c0_1 = arith.constant 0 : index
    %3 = vector.load %arg2[%c0, %c0_1] : memref<32x128xf32, #tpu.memory_space<vmem>>, vector<32x128xf32>
    %c0_2 = arith.constant 0 : index
    %c0_3 = arith.constant 0 : index
    %4 = vector.load %arg3[%c0_2, %c0_3] : memref<32x128xf32, #tpu.memory_space<vmem>>, vector<32x128xf32>
    %cst = arith.constant 0.000000e+00 : f32
    %5 = vector.broadcast %cst : f32 to vector<32x128xf32>
    %6 = arith.maximumf %3, %5 : vector<32x128xf32>
    %7 = math.log1p %6 : vector<32x128xf32>
    %cst_4 = arith.constant 0.000000e+00 : f32
    %8 = vector.broadcast %cst_4 : f32 to vector<32x128xf32>
    %9 = arith.maximumf %4, %8 : vector<32x128xf32>
    %10 = math.log1p %9 : vector<32x128xf32>
    %11 = arith.subf %7, %10 : vector<32x128xf32>
    %12 = arith.mulf %11, %11 : vector<32x128xf32>
    %c0_5 = arith.constant 0 : index
    %c0_6 = arith.constant 0 : index
    %13 = vector.load %arg5[%c0_5, %c0_6] : memref<8x128xf32, #tpu.memory_space<vmem>>, vector<8x128xf32>
    %14 = vector.shape_cast %12 : vector<32x128xf32> to vector<4x8x128xf32>
    %cst_7 = arith.constant dense<0.000000e+00> : vector<8x128xf32>
    %15 = vector.multi_reduction <add>, %14, %cst_7 [0] : vector<4x8x128xf32> to vector<8x128xf32>
    %16 = arith.addf %13, %15 : vector<8x128xf32>
    %c0_8 = arith.constant 0 : index
    %c0_9 = arith.constant 0 : index
    %17 = vector.load %arg5[%c0_8, %c0_9] : memref<8x128xf32, #tpu.memory_space<vmem>>, vector<8x128xf32>
    tpu.vector_store %arg5[%c0_8, %c0_9], %16 {strides = array<i32>} : memref<8x128xf32, #tpu.memory_space<vmem>>, vector<8x128xf32>,
    %c0_i32_10 = arith.constant 0 : i32
    %18 = arith.cmpi eq, %arg1, %c0_i32_10 : i32
    %19 = arith.extui %18 : i1 to i32
    %c0_i32_11 = arith.constant 0 : i32
    %20 = arith.cmpi ne, %19, %c0_i32_11 : i32
    scf.if %20 {
      %c0_12 = arith.constant 0 : index
      %c0_13 = arith.constant 0 : index
      %21 = vector.load %arg5[%c0_12, %c0_13] : memref<8x128xf32, #tpu.memory_space<vmem>>, vector<8x128xf32>
      %22 = vector.shape_cast %21 : vector<8x128xf32> to vector<1x8x128xf32>
      %cst_14 = arith.constant dense<0.000000e+00> : vector<1xf32>
      %23 = vector.multi_reduction <add>, %22, %cst_14 [1, 2] : vector<1x8x128xf32> to vector<1xf32>
      %24 = vector.shape_cast %23 : vector<1xf32> to vector<1x1x1xf32>
      %25 = vector.extract %24[0, 0, 0] : f32 from vector<1x1x1xf32>
      %c0_15 = arith.constant 0 : index
      %c0_16 = arith.constant 0 : index
      %26 = memref.load %arg4[%c0_15, %c0_16] : memref<1x1xf32, #tpu.memory_space<smem>>
      memref.store %25, %arg4[%c0_15, %c0_16] : memref<1x1xf32, #tpu.memory_space<smem>>
    } else {
    }
    return
  }
  func.func @transform_0(%arg0: i32, %arg1: i32) -> (i32, i32) {
    %c1_i32 = arith.constant 1 : i32
    %0 = arith.muli %arg0, %c1_i32 : i32
    %1 = arith.addi %0, %arg1 : i32
    %c0_i32 = arith.constant 0 : i32
    %2 = arith.minsi %1, %c0_i32 : i32
    %c0_i32_0 = arith.constant 0 : i32
    %c0_i32_1 = arith.constant 0 : i32
    return %2, %c0_i32_0 : i32, i32
  }
  func.func @transform_1(%arg0: i32, %arg1: i32) -> (i32, i32) {
    %c1_i32 = arith.constant 1 : i32
    %0 = arith.muli %arg0, %c1_i32 : i32
    %1 = arith.addi %0, %arg1 : i32
    %c0_i32 = arith.constant 0 : i32
    %2 = arith.minsi %1, %c0_i32 : i32
    %c0_i32_0 = arith.constant 0 : i32
    %c0_i32_1 = arith.constant 0 : i32
    return %2, %c0_i32_0 : i32, i32
  }
  func.func @transform_2(%arg0: i32, %arg1: i32) -> (i32, i32) {
    %c0_i32 = arith.constant 0 : i32
    %c0_i32_0 = arith.constant 0 : i32
    return %arg0, %c0_i32 : i32, i32
  }
}

</mosaic_0001>

<bundles_post_ra>
// kernel: tpu_custom_call.1
= control target key start
LH: loop header
LB: loop body
LE: loop exit
PB: predicated region body
PF: predicated region fallthrough
CT: control target
= control target key end

     0   :  { %7 = vsyncpa [#allocation4], 0  ;;  %s373_s0 = inlined_call_operand.hbm [shape: f32[32,128], index: 0, kind: input, shape index: {}]   ;;  %s374_s1 = inlined_call_operand.hbm [shape: f32[32,128], index: 1, kind: input, shape index: {}]   ;;  %s375_s2 = inlined_call_operand.hbm [shape: f32[1,1], index: 2, kind: output, shape index: {}]  }
   0x1   :  { %8 = vsyncpa [#allocation7], 0 }
   0x2   :  { %9 = vsyncpa [#allocation5], 0  ;;  %s20_s11 = sshll.u32 %s373_s0, 4  ;;  %s296_s12 = smov [#allocation3]   ;;  %s21_s11 = int_to_ptr.hbm [resolvable:$true] %s20_s11 }
   0x3   :  { %s22_s13 = sshll.u32 %s296_s12, 4  ;;  %s39_s16 = sshll.u32 %s374_s1, 4  ;;  %s23_s13 = int_to_ptr.vmem [resolvable:$true] %s22_s13  ;;  %s40_s16 = int_to_ptr.hbm [resolvable:$true] %s39_s16 }
   0x4   :  { %s297_s17 = smov 128   ;;  %s298_s18 = smov 8  }
   0x5   :  { %28 = dma.hbm_to_vmem [thread:$0]  %s21_s11, 512, %s23_s13, [#allocation4], %s297_s17, %s297_s17, %s298_s18  }
   0x6   :  { %s299_s19 = smov [#allocation6]  }
   0x7   :  { %s41_s20 = sshll.u32 %s299_s19, 4  ;;  %s42_s20 = int_to_ptr.vmem [resolvable:$true] %s41_s20 }
   0x8   :  { %47 = dma.hbm_to_vmem [thread:$0]  %s40_s16, 512, %s42_s20, [#allocation7], %s297_s17, %s297_s17, %s298_s18  }
   0x9   :  { %290 = dma.done.wait [#allocation4], 512  }
   0xa   :  { %291 = vsyncadd [#allocation4], 4294966784 }
   0xb   :  { %292 = dma.done.wait [#allocation7], 512  }
   0xc   :  { %293 = vsyncadd [#allocation7], 4294966784  ;;  %v69_v0 = vld [vmem:[#allocation3] sm:$0xff]  ;;  %v70_v1 = vld [vmem:[#allocation3 + $0x8] sm:$0xff]  ;;  %s191_s21 = sshll.u32 %s375_s2, 4  ;;  %s300_s23 = smov [#allocation8]   ;;  %s192_s21 = int_to_ptr.hbm [resolvable:$true] %s191_s21 }
   0xd   :  { %v71_v2 = vld [vmem:[#allocation3 + $0x10] sm:$0xff]  ;;  %v72_v3 = vld [vmem:[#allocation3 + $0x18] sm:$0xff]  ;;  %v77_v4 = vmax.f32 %v69_v0, 0.0  ;;  %v78_v5 = vmax.f32 %v70_v1, 0.0  ;;  %v73_v7 = vld [vmem:[#allocation6] sm:$0xff] }
   0xe   :  { %v322_v6 = vmax.f32 %v71_v2, 0.0  ;;  %v74_v10 = vld [vmem:[#allocation6 + $0x8] sm:$0xff]  ;;  %v324_v11 = vmax.f32 %v72_v3, 0.0  ;;  %v117_v16 = vmax.f32 %v73_v7, 0.0  ;;  %v75_v18 = vld [vmem:[#allocation6 + $0x10] sm:$0xff]  ;;  %v76_v20 = vld [vmem:[#allocation6 + $0x18] sm:$0xff] }
   0xf   :  { %v81_v8 = vadd.f32 1.0, %v77_v4  ;;  %v90_v9 = vadd.f32 1.0, %v78_v5  ;;  %v84_v12 = vmul.f32 -0.5, %v77_v4  ;;  %v87_v14 = vand.u32 2147483647, %v77_v4 }
  0x10   :  { %v99_v13 = vadd.f32 1.0, %v322_v6  ;;  %v93_v15 = vmul.f32 -0.5, %v78_v5  ;;  %v102_v17 = vmul.f32 -0.5, %v322_v6  ;;  %v118_v19 = vmax.f32 %v74_v10, 0.0 }
  0x11   :  { %214 = vlog2.f32 %v81_v8  ;;  %v85_v21 = vadd.f32 1.0, %v84_v12  ;;  %v96_v22 = vand.u32 2147483647, %v78_v5  ;;  %v108_v23 = vadd.f32 1.0, %v324_v11 }
  0x12   :  { %216 = vlog2.f32 %v90_v9  ;;  %vm329_vm0 = vcmp.lt.f32.partialorder %v87_v14, 0.0004427343  ;;  %v94_v25 = vadd.f32 1.0, %v93_v15  ;;  %v105_v26 = vand.u32 2147483647, %v322_v6 }
  0x13   :  { %218 = vlog2.f32 %v99_v13  ;;  %v121_v27 = vadd.f32 1.0, %v117_v16  ;;  %v103_v28 = vadd.f32 1.0, %v102_v17  ;;  %v111_v29 = vmul.f32 -0.5, %v324_v11 }
  0x14   :  { %v119_v30 = vmax.f32 %v75_v18, 0.0  ;;  %v124_v31 = vmul.f32 -0.5, %v117_v16  ;;  %v127_v33 = vand.u32 2147483647, %v117_v16  ;;  %v130_v34 = vadd.f32 1.0, %v118_v19 }
  0x15   :  { %220 = vlog2.f32 %v121_v27  ;;  %v133_v35 = vmul.f32 -0.5, %v118_v19  ;;  %vm335_vm1 = vcmp.lt.f32.partialorder %v96_v22, 0.0004427343  ;;  %v120_v37 = vmax.f32 %v76_v20, 0.0 }
  0x16   :  { %222 = vlog2.f32 %v108_v23  ;;  %v125_v38 = vadd.f32 1.0, %v124_v31  ;;  %v86_v41 = vmul.f32 %v85_v21, %v77_v4  ;;  %v95_v42 = vmul.f32 %v94_v25, %v78_v5 }
  0x17   :  { %v215_v32 = vpop.eup %214  ;;  %224 = vlog2.f32 %v130_v34  ;;  %v104_v44 = vmul.f32 %v103_v28, %v322_v6  ;;  %v114_v45 = vand.u32 2147483647, %v324_v11  ;;  %v134_v46 = vadd.f32 1.0, %v133_v35 }
  0x18   :  { %v217_v39 = vpop.eup %216  ;;  %v83_v40 = vmul.f32 0.6931472, %v215_v32  ;;  %v139_v47 = vadd.f32 1.0, %v119_v30  ;;  %v112_v48 = vadd.f32 1.0, %v111_v29  ;;  %vm341_vm2 = vcmp.lt.f32.partialorder %v127_v33, 0.0004427343 }
  0x19   :  { %v219_v43 = vpop.eup %218  ;;  %v136_v50 = vand.u32 2147483647, %v118_v19  ;;  %v142_v51 = vmul.f32 -0.5, %v119_v30  ;;  %v92_v52 = vmul.f32 0.6931472, %v217_v39  ;;  %v126_v53 = vmul.f32 %v125_v38, %v117_v16 }
  0x1a   :  { %226 = vlog2.f32 %v139_v47  ;;  %v148_v54 = vadd.f32 1.0, %v120_v37  ;;  %v89_v56 = vsel %vm329_vm0, %v86_v41, %v83_v40  ;;  %v101_v57 = vmul.f32 0.6931472, %v219_v43 }
  0x1b   :  { %v221_v55 = vpop.eup %220  ;;  %v143_v58 = vadd.f32 1.0, %v142_v51  ;;  %v151_v59 = vmul.f32 -0.5, %v120_v37  ;;  %v135_v62 = vmul.f32 %v134_v46, %v118_v19  ;;  %v145_v63 = vand.u32 2147483647, %v119_v30 }
  0x1c   :  { %v223_v60 = vpop.eup %222  ;;  %v123_v61 = vmul.f32 0.6931472, %v221_v55  ;;  %228 = vlog2.f32 %v148_v54  ;;  %vm347_vm3 = vcmp.lt.f32.partialorder %v105_v26, 0.0004427343  ;;  %vm351_vm4 = vcmp.lt.f32.partialorder %v136_v50, 0.0004427343 }
  0x1d   :  { %v225_v0 = vpop.eup %224  ;;  %v152_v3 = vadd.f32 1.0, %v151_v59  ;;  %v98_v4 = vsel %vm335_vm1, %v95_v42, %v92_v52  ;;  %v154_v7 = vand.u32 2147483647, %v120_v37  ;;  %v110_v8 = vmul.f32 0.6931472, %v223_v60 }
  0x1e   :  { %v129_v5 = vsel %vm341_vm2, %v126_v53, %v123_v61  ;;  %v132_v6 = vmul.f32 0.6931472, %v225_v0  ;;  %v113_v9 = vmul.f32 %v112_v48, %v324_v11  ;;  %v144_v10 = vmul.f32 %v143_v58, %v119_v30 }
  0x1f   :  { %v157_v12 = vsub.f32 %v89_v56, %v129_v5  ;;  %v107_v14 = vsel %vm347_vm3, %v104_v44, %v101_v57  ;;  %vm362_vm5 = vcmp.lt.f32.partialorder %v114_v45, 0.0004427343  ;;  %vm146_vm6 = vcmp.lt.f32.partialorder %v145_v63, 0.0004427343 }
  0x20   :  { %v227_v13 = vpop.eup %226  ;;  %v138_v16 = vsel %vm351_vm4, %v135_v62, %v132_v6  ;;  %v153_v18 = vmul.f32 %v152_v3, %v120_v37  ;;  %vm155_vm7 = vcmp.lt.f32.partialorder %v154_v7, 0.0004427343  ;;  %v116_v11 = vsel %vm362_vm5, %v113_v9, %v110_v8 }
  0x21   :  { %v141_v17 = vmul.f32 0.6931472, %v227_v13  ;;  %v158_v19 = vsub.f32 %v98_v4, %v138_v16  ;;  %v161_v20 = vmul.f32 %v157_v12, %v157_v12 }
  0x22   :  { %v229_v21 = vpop.eup %228 }
  0x23   :  { %v147_v22 = vsel %vm146_vm6, %v144_v10, %v141_v17  ;;  %v150_v23 = vmul.f32 0.6931472, %v229_v21  ;;  %v162_v24 = vmul.f32 %v158_v19, %v158_v19 }
  0x24   :  { %v159_v25 = vsub.f32 %v107_v14, %v147_v22 }
  0x25   :  { %v156_v26 = vsel %vm155_vm7, %v153_v18, %v150_v23  ;;  %v166_v27 = vadd.f32 %v162_v24, %v161_v20 }
  0x26   :  { %v160_v28 = vsub.f32 %v116_v11, %v156_v26  ;;  %v163_v29 = vmul.f32 %v159_v25, %v159_v25 }
  0x28   :  { %v164_v30 = vmul.f32 %v160_v28, %v160_v28  ;;  %v167_v31 = vadd.f32 %v166_v27, %v163_v29 }
  0x2a   :  { %v168_v32 = vadd.f32 %v167_v31, %v164_v30 }
  0x2c   :  { %175 = vadd.xlane.f32.xlu0 %v168_v32 }
  0x9f   :  { %v176_v33 = vpop.xlane.xlu0 %175 }
  0xa0   :  { %v177_v34 = vrot.slane %v176_v33, 4 }
  0xa2   :  { %v178_v35 = vadd.f32 %v177_v34, %v176_v33 }
  0xa4   :  { %v179_v36 = vrot.slane %v178_v35, 2 }
  0xa6   :  { %v180_v37 = vadd.f32 %v179_v36, %v178_v35 }
  0xa8   :  { %v181_v38 = vrot.slane %v180_v37, 1 }
  0xaa   :  { %v182_v39 = vadd.f32 %v181_v38, %v180_v37 }
  0xac   :  { %207 = vpush %v182_v39 }
  0xdd   :  { %s208_s22 = spop %207 }
  0xde   :  { %185 = sst [smem:[#allocation8]] %s208_s22 }
  0xdf   :  { %194 = dma.smem_to_hbm %s300_s23, 16, %s192_s21, [#allocation5]  }
  0xe0   :  { %294 = dma.done.wait [#allocation5], 16  }
  0xe1   :  { %295 = vsyncadd [#allocation5], 4294967280 }
  0xe2   :  { %199 = sfence }
  0xe3   :  { %200 = vsyncpa [#allocation4], 1 }
  0xe4   :  { %201 = vsyncpa [#allocation7], 1 }
  0xe5   :  { %202 = vsyncpa [#allocation5], 1 }

</bundles_post_ra>
